<compile_context>
chip_gen: v6e
topology: v6e:2x2x1
jax: 0.10.0
libtpu: 0.0.40
codegen_flags: <defaults>
</compile_context>

<pallas_src>
import jax
import jax.numpy as jnp
from jax.experimental import pallas as pl
from jax.experimental.pallas import tpu as pltpu

SLICE_LIMIT = 65535  # from t3 = t2[:, 0:65535] in the PyTorch module


def _make_dma_kernel(n_list, n_total, slice_len):
    """Build a pure-DMA kernel.

    All refs are raw HBM refs; the body issues one async copy per output
    window (t1 region + duplicated/clamped t3 prefix) and waits on all of
    them at the end so every DMA is in flight concurrently.
    """
    offsets = []
    off = 0
    for n in n_list:
        offsets.append(off)
        off += n

    # Static copy plan: (input_index, src_channel_count_or_None, dst_start, dst_len)
    plan = []
    for i, (n, start) in enumerate(zip(n_list, offsets)):
        plan.append((i, None, start, n))            # t1 window: full input
        cnt = min(n, slice_len - start)             # t3 prefix, clamped at slice_len
        if cnt > 0:
            plan.append((i, cnt, n_total + start, cnt))

    num_copies = len(plan)
    num_in = len(n_list)

    def kernel(*refs):
        in_refs = refs[:num_in]
        o_ref = refs[num_in]
        sem = refs[num_in + 1]

        copies = []
        for si, (i, cnt, dst_start, dst_len) in enumerate(plan):
            if cnt is None:
                src = in_refs[i]
            else:
                src = in_refs[i].at[:, 0:cnt, :, :]
            dst = o_ref.at[:, dst_start:dst_start + dst_len, :, :]
            cp = pltpu.make_async_copy(src, dst, sem.at[si])
            cp.start()
            copies.append(cp)
        # Single wait group: all HBM->HBM DMAs overlap with each other.
        for cp in copies:
            cp.wait()

    return kernel, num_copies


def cat_slice_cat(x1, x2, x3, x4):
    xs = (x1, x2, x3, x4)
    B, _, H, W = x1.shape
    n_list = tuple(int(x.shape[1]) for x in xs)
    n_total = sum(n_list)
    slice_len = min(SLICE_LIMIT, n_total)
    n_out = n_total + slice_len
    dtype = x1.dtype

    kernel, num_copies = _make_dma_kernel(n_list, n_total, slice_len)

    return pl.pallas_call(
        kernel,
        out_shape=jax.ShapeDtypeStruct((B, n_out, H, W), dtype),
        in_specs=[pl.BlockSpec(memory_space=pl.ANY) for _ in xs],
        out_specs=pl.BlockSpec(memory_space=pl.ANY),
        scratch_shapes=[pltpu.SemaphoreType.DMA((num_copies,))],
        compiler_params=pltpu.CompilerParams(has_side_effects=True),
    )(*xs)


def reference(x1, x2, x3, x4):
    t1 = jnp.concatenate([x1, x2, x3, x4], axis=1)
    t3 = t1[:, 0:SLICE_LIMIT]
    return jnp.concatenate([t1, t3], axis=1)


if __name__ == "__main__":
    key = jax.random.PRNGKey(0)
    k1, k2, k3, k4 = jax.random.split(key, 4)

    # Small shapes consistent with the forward: 4 NCHW tensors that differ
    # only along dim 1 (the cat axis).
    B, H, W = 2, 32, 128
    x1 = jax.random.normal(k1, (B, 6, H, W), dtype=jnp.float32)
    x2 = jax.random.normal(k2, (B, 8, H, W), dtype=jnp.float32)
    x3 = jax.random.normal(k3, (B, 10, H, W), dtype=jnp.float32)
    x4 = jax.random.normal(k4, (B, 4, H, W), dtype=jnp.float32)

    out = jax.block_until_ready(cat_slice_cat(x1, x2, x3, x4))
    ref = reference(x1, x2, x3, x4)
    assert out.shape == ref.shape, (out.shape, ref.shape)
    assert bool(jnp.array_equal(out, ref)), "mismatch (lane-dense case)"

    # Second case with W not a multiple of 128 — the DMA path is layout
    # agnostic, no masked stores / reshape plumbing needed.
    B2, H2, W2 = 2, 16, 64
    y1 = jax.random.normal(k1, (B2, 3, H2, W2), dtype=jnp.float32)
    y2 = jax.random.normal(k2, (B2, 5, H2, W2), dtype=jnp.float32)
    y3 = jax.random.normal(k3, (B2, 2, H2, W2), dtype=jnp.float32)
    y4 = jax.random.normal(k4, (B2, 6, H2, W2), dtype=jnp.float32)

    out2 = jax.block_until_ready(cat_slice_cat(y1, y2, y3, y4))
    ref2 = reference(y1, y2, y3, y4)
    assert out2.shape == ref2.shape, (out2.shape, ref2.shape)
    assert bool(jnp.array_equal(out2, ref2)), "mismatch (unaligned-W case)"

    print("KERNEL_OK")
</pallas_src>

<mosaic_0001>
module attributes {stable_mosaic.version = 11 : i64} {
  func.func @kernel(%arg0: memref<2x6x32x128xf32, #tpu.memory_space<any>>, %arg1: memref<2x8x32x128xf32, #tpu.memory_space<any>>, %arg2: memref<2x10x32x128xf32, #tpu.memory_space<any>>, %arg3: memref<2x4x32x128xf32, #tpu.memory_space<any>>, %arg4: memref<2x56x32x128xf32, #tpu.memory_space<any>>, %arg5: memref<8x!tpu.dma_semaphore, #tpu.memory_space<semaphore_mem>>) attributes {dimension_semantics = [], scalar_prefetch = 0 : i64, scratch_operands = 1 : i64, tpu.core_type = #tpu.core_type<tc>} {
    %c0_i32 = arith.constant 0 : i32
    %c0_i32_0 = arith.constant 0 : i32
    %c0_i32_1 = arith.constant 0 : i32
    %c0_i32_2 = arith.constant 0 : i32
    %c0_i32_3 = arith.constant 0 : i32
    %0 = tpu.memref_slice %arg4[%c0_i32_0, %c0_i32_1, %c0_i32_2, %c0_i32_3] : memref<2x56x32x128xf32, #tpu.memory_space<any>> -> memref<2x6x32x128xf32, #tpu.memory_space<any>>
    %1 = tpu.memref_slice %arg5[%c0_i32] : memref<8x!tpu.dma_semaphore, #tpu.memory_space<semaphore_mem>> -> memref<1x!tpu.dma_semaphore, #tpu.memory_space<semaphore_mem>>
    %2 = tpu.memref_squeeze %1 : memref<1x!tpu.dma_semaphore, #tpu.memory_space<semaphore_mem>> -> memref<!tpu.dma_semaphore, #tpu.memory_space<semaphore_mem>>
    tpu.enqueue_dma source(%arg0 : memref<2x6x32x128xf32, #tpu.memory_space<any>>) target(%0 : memref<2x6x32x128xf32, #tpu.memory_space<any>>) target_semaphore(%2 : memref<!tpu.dma_semaphore, #tpu.memory_space<semaphore_mem>>)
    %c1_i32 = arith.constant 1 : i32
    %c0_i32_4 = arith.constant 0 : i32
    %c0_i32_5 = arith.constant 0 : i32
    %c0_i32_6 = arith.constant 0 : i32
    %c0_i32_7 = arith.constant 0 : i32
    %3 = tpu.memref_slice %arg0[%c0_i32_4, %c0_i32_5, %c0_i32_6, %c0_i32_7] : memref<2x6x32x128xf32, #tpu.memory_space<any>> -> memref<2x6x32x128xf32, #tpu.memory_space<any>>
    %c0_i32_8 = arith.constant 0 : i32
    %c28_i32 = arith.constant 28 : i32
    %c0_i32_9 = arith.constant 0 : i32
    %c0_i32_10 = arith.constant 0 : i32
    %4 = tpu.memref_slice %arg4[%c0_i32_8, %c28_i32, %c0_i32_9, %c0_i32_10] : memref<2x56x32x128xf32, #tpu.memory_space<any>> -> memref<2x6x32x128xf32, #tpu.memory_space<any>>
    %5 = tpu.memref_slice %arg5[%c1_i32] : memref<8x!tpu.dma_semaphore, #tpu.memory_space<semaphore_mem>> -> memref<1x!tpu.dma_semaphore, #tpu.memory_space<semaphore_mem>>
    %6 = tpu.memref_squeeze %5 : memref<1x!tpu.dma_semaphore, #tpu.memory_space<semaphore_mem>> -> memref<!tpu.dma_semaphore, #tpu.memory_space<semaphore_mem>>
    tpu.enqueue_dma source(%3 : memref<2x6x32x128xf32, #tpu.memory_space<any>>) target(%4 : memref<2x6x32x128xf32, #tpu.memory_space<any>>) target_semaphore(%6 : memref<!tpu.dma_semaphore, #tpu.memory_space<semaphore_mem>>)
    %c2_i32 = arith.constant 2 : i32
    %c0_i32_11 = arith.constant 0 : i32
    %c6_i32 = arith.constant 6 : i32
    %c0_i32_12 = arith.constant 0 : i32
    %c0_i32_13 = arith.constant 0 : i32
    %7 = tpu.memref_slice %arg4[%c0_i32_11, %c6_i32, %c0_i32_12, %c0_i32_13] : memref<2x56x32x128xf32, #tpu.memory_space<any>> -> memref<2x8x32x128xf32, #tpu.memory_space<any>>
    %8 = tpu.memref_slice %arg5[%c2_i32] : memref<8x!tpu.dma_semaphore, #tpu.memory_space<semaphore_mem>> -> memref<1x!tpu.dma_semaphore, #tpu.memory_space<semaphore_mem>>
    %9 = tpu.memref_squeeze %8 : memref<1x!tpu.dma_semaphore, #tpu.memory_space<semaphore_mem>> -> memref<!tpu.dma_semaphore, #tpu.memory_space<semaphore_mem>>
    tpu.enqueue_dma source(%arg1 : memref<2x8x32x128xf32, #tpu.memory_space<any>>) target(%7 : memref<2x8x32x128xf32, #tpu.memory_space<any>>) target_semaphore(%9 : memref<!tpu.dma_semaphore, #tpu.memory_space<semaphore_mem>>)
    %c3_i32 = arith.constant 3 : i32
    %c0_i32_14 = arith.constant 0 : i32
    %c0_i32_15 = arith.constant 0 : i32
    %c0_i32_16 = arith.constant 0 : i32
    %c0_i32_17 = arith.constant 0 : i32
    %10 = tpu.memref_slice %arg1[%c0_i32_14, %c0_i32_15, %c0_i32_16, %c0_i32_17] : memref<2x8x32x128xf32, #tpu.memory_space<any>> -> memref<2x8x32x128xf32, #tpu.memory_space<any>>
    %c0_i32_18 = arith.constant 0 : i32
    %c34_i32 = arith.constant 34 : i32
    %c0_i32_19 = arith.constant 0 : i32
    %c0_i32_20 = arith.constant 0 : i32
    %11 = tpu.memref_slice %arg4[%c0_i32_18, %c34_i32, %c0_i32_19, %c0_i32_20] : memref<2x56x32x128xf32, #tpu.memory_space<any>> -> memref<2x8x32x128xf32, #tpu.memory_space<any>>
    %12 = tpu.memref_slice %arg5[%c3_i32] : memref<8x!tpu.dma_semaphore, #tpu.memory_space<semaphore_mem>> -> memref<1x!tpu.dma_semaphore, #tpu.memory_space<semaphore_mem>>
    %13 = tpu.memref_squeeze %12 : memref<1x!tpu.dma_semaphore, #tpu.memory_space<semaphore_mem>> -> memref<!tpu.dma_semaphore, #tpu.memory_space<semaphore_mem>>
    tpu.enqueue_dma source(%10 : memref<2x8x32x128xf32, #tpu.memory_space<any>>) target(%11 : memref<2x8x32x128xf32, #tpu.memory_space<any>>) target_semaphore(%13 : memref<!tpu.dma_semaphore, #tpu.memory_space<semaphore_mem>>)
    %c4_i32 = arith.constant 4 : i32
    %c0_i32_21 = arith.constant 0 : i32
    %c14_i32 = arith.constant 14 : i32
    %c0_i32_22 = arith.constant 0 : i32
    %c0_i32_23 = arith.constant 0 : i32
    %14 = tpu.memref_slice %arg4[%c0_i32_21, %c14_i32, %c0_i32_22, %c0_i32_23] : memref<2x56x32x128xf32, #tpu.memory_space<any>> -> memref<2x10x32x128xf32, #tpu.memory_space<any>>
    %15 = tpu.memref_slice %arg5[%c4_i32] : memref<8x!tpu.dma_semaphore, #tpu.memory_space<semaphore_mem>> -> memref<1x!tpu.dma_semaphore, #tpu.memory_space<semaphore_mem>>
    %16 = tpu.memref_squeeze %15 : memref<1x!tpu.dma_semaphore, #tpu.memory_space<semaphore_mem>> -> memref<!tpu.dma_semaphore, #tpu.memory_space<semaphore_mem>>
    tpu.enqueue_dma source(%arg2 : memref<2x10x32x128xf32, #tpu.memory_space<any>>) target(%14 : memref<2x10x32x128xf32, #tpu.memory_space<any>>) target_semaphore(%16 : memref<!tpu.dma_semaphore, #tpu.memory_space<semaphore_mem>>)
    %c5_i32 = arith.constant 5 : i32
    %c0_i32_24 = arith.constant 0 : i32
    %c0_i32_25 = arith.constant 0 : i32
    %c0_i32_26 = arith.constant 0 : i32
    %c0_i32_27 = arith.constant 0 : i32
    %17 = tpu.memref_slice %arg2[%c0_i32_24, %c0_i32_25, %c0_i32_26, %c0_i32_27] : memref<2x10x32x128xf32, #tpu.memory_space<any>> -> memref<2x10x32x128xf32, #tpu.memory_space<any>>
    %c0_i32_28 = arith.constant 0 : i32
    %c42_i32 = arith.constant 42 : i32
    %c0_i32_29 = arith.constant 0 : i32
    %c0_i32_30 = arith.constant 0 : i32
    %18 = tpu.memref_slice %arg4[%c0_i32_28, %c42_i32, %c0_i32_29, %c0_i32_30] : memref<2x56x32x128xf32, #tpu.memory_space<any>> -> memref<2x10x32x128xf32, #tpu.memory_space<any>>
    %19 = tpu.memref_slice %arg5[%c5_i32] : memref<8x!tpu.dma_semaphore, #tpu.memory_space<semaphore_mem>> -> memref<1x!tpu.dma_semaphore, #tpu.memory_space<semaphore_mem>>
    %20 = tpu.memref_squeeze %19 : memref<1x!tpu.dma_semaphore, #tpu.memory_space<semaphore_mem>> -> memref<!tpu.dma_semaphore, #tpu.memory_space<semaphore_mem>>
    tpu.enqueue_dma source(%17 : memref<2x10x32x128xf32, #tpu.memory_space<any>>) target(%18 : memref<2x10x32x128xf32, #tpu.memory_space<any>>) target_semaphore(%20 : memref<!tpu.dma_semaphore, #tpu.memory_space<semaphore_mem>>)
    %c6_i32_31 = arith.constant 6 : i32
    %c0_i32_32 = arith.constant 0 : i32
    %c24_i32 = arith.constant 24 : i32
    %c0_i32_33 = arith.constant 0 : i32
    %c0_i32_34 = arith.constant 0 : i32
    %21 = tpu.memref_slice %arg4[%c0_i32_32, %c24_i32, %c0_i32_33, %c0_i32_34] : memref<2x56x32x128xf32, #tpu.memory_space<any>> -> memref<2x4x32x128xf32, #tpu.memory_space<any>>
    %22 = tpu.memref_slice %arg5[%c6_i32_31] : memref<8x!tpu.dma_semaphore, #tpu.memory_space<semaphore_mem>> -> memref<1x!tpu.dma_semaphore, #tpu.memory_space<semaphore_mem>>
    %23 = tpu.memref_squeeze %22 : memref<1x!tpu.dma_semaphore, #tpu.memory_space<semaphore_mem>> -> memref<!tpu.dma_semaphore, #tpu.memory_space<semaphore_mem>>
    tpu.enqueue_dma source(%arg3 : memref<2x4x32x128xf32, #tpu.memory_space<any>>) target(%21 : memref<2x4x32x128xf32, #tpu.memory_space<any>>) target_semaphore(%23 : memref<!tpu.dma_semaphore, #tpu.memory_space<semaphore_mem>>)
    %c7_i32 = arith.constant 7 : i32
    %c0_i32_35 = arith.constant 0 : i32
    %c0_i32_36 = arith.constant 0 : i32
    %c0_i32_37 = arith.constant 0 : i32
    %c0_i32_38 = arith.constant 0 : i32
    %24 = tpu.memref_slice %arg3[%c0_i32_35, %c0_i32_36, %c0_i32_37, %c0_i32_38] : memref<2x4x32x128xf32, #tpu.memory_space<any>> -> memref<2x4x32x128xf32, #tpu.memory_space<any>>
    %c0_i32_39 = arith.constant 0 : i32
    %c52_i32 = arith.constant 52 : i32
    %c0_i32_40 = arith.constant 0 : i32
    %c0_i32_41 = arith.constant 0 : i32
    %25 = tpu.memref_slice %arg4[%c0_i32_39, %c52_i32, %c0_i32_40, %c0_i32_41] : memref<2x56x32x128xf32, #tpu.memory_space<any>> -> memref<2x4x32x128xf32, #tpu.memory_space<any>>
    %26 = tpu.memref_slice %arg5[%c7_i32] : memref<8x!tpu.dma_semaphore, #tpu.memory_space<semaphore_mem>> -> memref<1x!tpu.dma_semaphore, #tpu.memory_space<semaphore_mem>>
    %27 = tpu.memref_squeeze %26 : memref<1x!tpu.dma_semaphore, #tpu.memory_space<semaphore_mem>> -> memref<!tpu.dma_semaphore, #tpu.memory_space<semaphore_mem>>
    tpu.enqueue_dma source(%24 : memref<2x4x32x128xf32, #tpu.memory_space<any>>) target(%25 : memref<2x4x32x128xf32, #tpu.memory_space<any>>) target_semaphore(%27 : memref<!tpu.dma_semaphore, #tpu.memory_space<semaphore_mem>>)
    %c0_i32_42 = arith.constant 0 : i32
    %c0_i32_43 = arith.constant 0 : i32
    %c0_i32_44 = arith.constant 0 : i32
    %c0_i32_45 = arith.constant 0 : i32
    %c0_i32_46 = arith.constant 0 : i32
    %28 = tpu.memref_slice %arg4[%c0_i32_43, %c0_i32_44, %c0_i32_45, %c0_i32_46] : memref<2x56x32x128xf32, #tpu.memory_space<any>> -> memref<2x6x32x128xf32, #tpu.memory_space<any>>
    %29 = tpu.memref_slice %arg5[%c0_i32_42] : memref<8x!tpu.dma_semaphore, #tpu.memory_space<semaphore_mem>> -> memref<1x!tpu.dma_semaphore, #tpu.memory_space<semaphore_mem>>
    %30 = tpu.memref_squeeze %29 : memref<1x!tpu.dma_semaphore, #tpu.memory_space<semaphore_mem>> -> memref<!tpu.dma_semaphore, #tpu.memory_space<semaphore_mem>>
    tpu.wait_dma2 semaphore(%30 : memref<!tpu.dma_semaphore, #tpu.memory_space<semaphore_mem>>) src(%arg0 : memref<2x6x32x128xf32, #tpu.memory_space<any>>) dst(%28 : memref<2x6x32x128xf32, #tpu.memory_space<any>>)
    %c1_i32_47 = arith.constant 1 : i32
    %c0_i32_48 = arith.constant 0 : i32
    %c0_i32_49 = arith.constant 0 : i32
    %c0_i32_50 = arith.constant 0 : i32
    %c0_i32_51 = arith.constant 0 : i32
    %31 = tpu.memref_slice %arg0[%c0_i32_48, %c0_i32_49, %c0_i32_50, %c0_i32_51] : memref<2x6x32x128xf32, #tpu.memory_space<any>> -> memref<2x6x32x128xf32, #tpu.memory_space<any>>
    %c0_i32_52 = arith.constant 0 : i32
    %c28_i32_53 = arith.constant 28 : i32
    %c0_i32_54 = arith.constant 0 : i32
    %c0_i32_55 = arith.constant 0 : i32
    %32 = tpu.memref_slice %arg4[%c0_i32_52, %c28_i32_53, %c0_i32_54, %c0_i32_55] : memref<2x56x32x128xf32, #tpu.memory_space<any>> -> memref<2x6x32x128xf32, #tpu.memory_space<any>>
    %33 = tpu.memref_slice %arg5[%c1_i32_47] : memref<8x!tpu.dma_semaphore, #tpu.memory_space<semaphore_mem>> -> memref<1x!tpu.dma_semaphore, #tpu.memory_space<semaphore_mem>>
    %34 = tpu.memref_squeeze %33 : memref<1x!tpu.dma_semaphore, #tpu.memory_space<semaphore_mem>> -> memref<!tpu.dma_semaphore, #tpu.memory_space<semaphore_mem>>
    tpu.wait_dma2 semaphore(%34 : memref<!tpu.dma_semaphore, #tpu.memory_space<semaphore_mem>>) src(%31 : memref<2x6x32x128xf32, #tpu.memory_space<any>>) dst(%32 : memref<2x6x32x128xf32, #tpu.memory_space<any>>)
    %c2_i32_56 = arith.constant 2 : i32
    %c0_i32_57 = arith.constant 0 : i32
    %c6_i32_58 = arith.constant 6 : i32
    %c0_i32_59 = arith.constant 0 : i32
    %c0_i32_60 = arith.constant 0 : i32
    %35 = tpu.memref_slice %arg4[%c0_i32_57, %c6_i32_58, %c0_i32_59, %c0_i32_60] : memref<2x56x32x128xf32, #tpu.memory_space<any>> -> memref<2x8x32x128xf32, #tpu.memory_space<any>>
    %36 = tpu.memref_slice %arg5[%c2_i32_56] : memref<8x!tpu.dma_semaphore, #tpu.memory_space<semaphore_mem>> -> memref<1x!tpu.dma_semaphore, #tpu.memory_space<semaphore_mem>>
    %37 = tpu.memref_squeeze %36 : memref<1x!tpu.dma_semaphore, #tpu.memory_space<semaphore_mem>> -> memref<!tpu.dma_semaphore, #tpu.memory_space<semaphore_mem>>
    tpu.wait_dma2 semaphore(%37 : memref<!tpu.dma_semaphore, #tpu.memory_space<semaphore_mem>>) src(%arg1 : memref<2x8x32x128xf32, #tpu.memory_space<any>>) dst(%35 : memref<2x8x32x128xf32, #tpu.memory_space<any>>)
    %c3_i32_61 = arith.constant 3 : i32
    %c0_i32_62 = arith.constant 0 : i32
    %c0_i32_63 = arith.constant 0 : i32
    %c0_i32_64 = arith.constant 0 : i32
    %c0_i32_65 = arith.constant 0 : i32
    %38 = tpu.memref_slice %arg1[%c0_i32_62, %c0_i32_63, %c0_i32_64, %c0_i32_65] : memref<2x8x32x128xf32, #tpu.memory_space<any>> -> memref<2x8x32x128xf32, #tpu.memory_space<any>>
    %c0_i32_66 = arith.constant 0 : i32
    %c34_i32_67 = arith.constant 34 : i32
    %c0_i32_68 = arith.constant 0 : i32
    %c0_i32_69 = arith.constant 0 : i32
    %39 = tpu.memref_slice %arg4[%c0_i32_66, %c34_i32_67, %c0_i32_68, %c0_i32_69] : memref<2x56x32x128xf32, #tpu.memory_space<any>> -> memref<2x8x32x128xf32, #tpu.memory_space<any>>
    %40 = tpu.memref_slice %arg5[%c3_i32_61] : memref<8x!tpu.dma_semaphore, #tpu.memory_space<semaphore_mem>> -> memref<1x!tpu.dma_semaphore, #tpu.memory_space<semaphore_mem>>
    %41 = tpu.memref_squeeze %40 : memref<1x!tpu.dma_semaphore, #tpu.memory_space<semaphore_mem>> -> memref<!tpu.dma_semaphore, #tpu.memory_space<semaphore_mem>>
    tpu.wait_dma2 semaphore(%41 : memref<!tpu.dma_semaphore, #tpu.memory_space<semaphore_mem>>) src(%38 : memref<2x8x32x128xf32, #tpu.memory_space<any>>) dst(%39 : memref<2x8x32x128xf32, #tpu.memory_space<any>>)
    %c4_i32_70 = arith.constant 4 : i32
    %c0_i32_71 = arith.constant 0 : i32
    %c14_i32_72 = arith.constant 14 : i32
    %c0_i32_73 = arith.constant 0 : i32
    %c0_i32_74 = arith.constant 0 : i32
    %42 = tpu.memref_slice %arg4[%c0_i32_71, %c14_i32_72, %c0_i32_73, %c0_i32_74] : memref<2x56x32x128xf32, #tpu.memory_space<any>> -> memref<2x10x32x128xf32, #tpu.memory_space<any>>
    %43 = tpu.memref_slice %arg5[%c4_i32_70] : memref<8x!tpu.dma_semaphore, #tpu.memory_space<semaphore_mem>> -> memref<1x!tpu.dma_semaphore, #tpu.memory_space<semaphore_mem>>
    %44 = tpu.memref_squeeze %43 : memref<1x!tpu.dma_semaphore, #tpu.memory_space<semaphore_mem>> -> memref<!tpu.dma_semaphore, #tpu.memory_space<semaphore_mem>>
    tpu.wait_dma2 semaphore(%44 : memref<!tpu.dma_semaphore, #tpu.memory_space<semaphore_mem>>) src(%arg2 : memref<2x10x32x128xf32, #tpu.memory_space<any>>) dst(%42 : memref<2x10x32x128xf32, #tpu.memory_space<any>>)
    %c5_i32_75 = arith.constant 5 : i32
    %c0_i32_76 = arith.constant 0 : i32
    %c0_i32_77 = arith.constant 0 : i32
    %c0_i32_78 = arith.constant 0 : i32
    %c0_i32_79 = arith.constant 0 : i32
    %45 = tpu.memref_slice %arg2[%c0_i32_76, %c0_i32_77, %c0_i32_78, %c0_i32_79] : memref<2x10x32x128xf32, #tpu.memory_space<any>> -> memref<2x10x32x128xf32, #tpu.memory_space<any>>
    %c0_i32_80 = arith.constant 0 : i32
    %c42_i32_81 = arith.constant 42 : i32
    %c0_i32_82 = arith.constant 0 : i32
    %c0_i32_83 = arith.constant 0 : i32
    %46 = tpu.memref_slice %arg4[%c0_i32_80, %c42_i32_81, %c0_i32_82, %c0_i32_83] : memref<2x56x32x128xf32, #tpu.memory_space<any>> -> memref<2x10x32x128xf32, #tpu.memory_space<any>>
    %47 = tpu.memref_slice %arg5[%c5_i32_75] : memref<8x!tpu.dma_semaphore, #tpu.memory_space<semaphore_mem>> -> memref<1x!tpu.dma_semaphore, #tpu.memory_space<semaphore_mem>>
    %48 = tpu.memref_squeeze %47 : memref<1x!tpu.dma_semaphore, #tpu.memory_space<semaphore_mem>> -> memref<!tpu.dma_semaphore, #tpu.memory_space<semaphore_mem>>
    tpu.wait_dma2 semaphore(%48 : memref<!tpu.dma_semaphore, #tpu.memory_space<semaphore_mem>>) src(%45 : memref<2x10x32x128xf32, #tpu.memory_space<any>>) dst(%46 : memref<2x10x32x128xf32, #tpu.memory_space<any>>)
    %c6_i32_84 = arith.constant 6 : i32
    %c0_i32_85 = arith.constant 0 : i32
    %c24_i32_86 = arith.constant 24 : i32
    %c0_i32_87 = arith.constant 0 : i32
    %c0_i32_88 = arith.constant 0 : i32
    %49 = tpu.memref_slice %arg4[%c0_i32_85, %c24_i32_86, %c0_i32_87, %c0_i32_88] : memref<2x56x32x128xf32, #tpu.memory_space<any>> -> memref<2x4x32x128xf32, #tpu.memory_space<any>>
    %50 = tpu.memref_slice %arg5[%c6_i32_84] : memref<8x!tpu.dma_semaphore, #tpu.memory_space<semaphore_mem>> -> memref<1x!tpu.dma_semaphore, #tpu.memory_space<semaphore_mem>>
    %51 = tpu.memref_squeeze %50 : memref<1x!tpu.dma_semaphore, #tpu.memory_space<semaphore_mem>> -> memref<!tpu.dma_semaphore, #tpu.memory_space<semaphore_mem>>
    tpu.wait_dma2 semaphore(%51 : memref<!tpu.dma_semaphore, #tpu.memory_space<semaphore_mem>>) src(%arg3 : memref<2x4x32x128xf32, #tpu.memory_space<any>>) dst(%49 : memref<2x4x32x128xf32, #tpu.memory_space<any>>)
    %c7_i32_89 = arith.constant 7 : i32
    %c0_i32_90 = arith.constant 0 : i32
    %c0_i32_91 = arith.constant 0 : i32
    %c0_i32_92 = arith.constant 0 : i32
    %c0_i32_93 = arith.constant 0 : i32
    %52 = tpu.memref_slice %arg3[%c0_i32_90, %c0_i32_91, %c0_i32_92, %c0_i32_93] : memref<2x4x32x128xf32, #tpu.memory_space<any>> -> memref<2x4x32x128xf32, #tpu.memory_space<any>>
    %c0_i32_94 = arith.constant 0 : i32
    %c52_i32_95 = arith.constant 52 : i32
    %c0_i32_96 = arith.constant 0 : i32
    %c0_i32_97 = arith.constant 0 : i32
    %53 = tpu.memref_slice %arg4[%c0_i32_94, %c52_i32_95, %c0_i32_96, %c0_i32_97] : memref<2x56x32x128xf32, #tpu.memory_space<any>> -> memref<2x4x32x128xf32, #tpu.memory_space<any>>
    %54 = tpu.memref_slice %arg5[%c7_i32_89] : memref<8x!tpu.dma_semaphore, #tpu.memory_space<semaphore_mem>> -> memref<1x!tpu.dma_semaphore, #tpu.memory_space<semaphore_mem>>
    %55 = tpu.memref_squeeze %54 : memref<1x!tpu.dma_semaphore, #tpu.memory_space<semaphore_mem>> -> memref<!tpu.dma_semaphore, #tpu.memory_space<semaphore_mem>>
    tpu.wait_dma2 semaphore(%55 : memref<!tpu.dma_semaphore, #tpu.memory_space<semaphore_mem>>) src(%52 : memref<2x4x32x128xf32, #tpu.memory_space<any>>) dst(%53 : memref<2x4x32x128xf32, #tpu.memory_space<any>>)
    return
  }
}

</mosaic_0001>

<bundles_post_ra>
// kernel: tpu_custom_call.1
= control target key start
LH: loop header
LB: loop body
LE: loop exit
PB: predicated region body
PF: predicated region fallthrough
CT: control target
= control target key end

     0   :  { %s253_s15 = smov 3072   ;;  %s254_s16 = smov 28672   ;;  %s369_s0 = inlined_call_operand.hbm [shape: f32[2,6,32,128], index: 0, kind: input, shape index: {}]   ;;  %s370_s1 = inlined_call_operand.hbm [shape: f32[2,8,32,128], index: 1, kind: input, shape index: {}]   ;;  %s371_s2 = inlined_call_operand.hbm [shape: f32[2,10,32,128], index: 2, kind: input, shape index: {}]   ;;  %s372_s3 = inlined_call_operand.hbm [shape: f32[2,4,32,128], index: 3, kind: input, shape index: {}]   ;;  %s373_s4 = inlined_call_operand.hbm [shape: f32[2,56,32,128], index: 4, kind: output, shape index: {}]  }
   0x1   :  { %15 = sst [smem:[#allocation4]] %s253_s15  ;;  %s255_s17 = smov 192  }
   0x2   :  { %17 = sst [smem:[#allocation4 + $0x1]] %s254_s16  ;;  %s22_s20 = scalar_lea.hbm %s373_s4, 14336 }
   0x3   :  { %19 = sst [smem:[#allocation4 + $0x2]] %s255_s17  ;;  %s256_s21 = smov [#allocation2]  }
   0x4   :  { %s257_s22 = smov 131072   ;;  %s258_s23 = smov 0  }
   0x5   :  { %21 = dma.general %s369_s0, 6144, %s373_s4, %s256_s21, %s257_s22, [#allocation4], %s258_s23, 0  }
   0x6   :  { %30 = sst [smem:[#allocation6]] %s253_s15  ;;  %s259_s28 = smov [#allocation2 + $0x1]  }
   0x7   :  { %32 = sst [smem:[#allocation6 + $0x1]] %s254_s16  ;;  %s260_s5 = smov 4096  }
   0x8   :  { %34 = sst [smem:[#allocation6 + $0x2]] %s255_s17  ;;  %s37_s8 = scalar_lea.hbm %s373_s4, 3072 }
   0x9   :  { %36 = dma.general %s369_s0, 6144, %s22_s20, %s259_s28, %s257_s22, [#allocation6], %s258_s23, 0  }
   0xa   :  { %45 = sst [smem:[#allocation8]] %s260_s5  ;;  %s261_s9 = smov 256  }
   0xb   :  { %47 = sst [smem:[#allocation8 + $0x1]] %s254_s16  ;;  %s52_s12 = scalar_lea.hbm %s373_s4, 17408 }
   0xc   :  { %49 = sst [smem:[#allocation8 + $0x2]] %s261_s9  ;;  %s262_s13 = smov [#allocation2 + $0x2]  }
   0xd   :  { %51 = dma.general %s370_s1, 8192, %s37_s8, %s262_s13, %s257_s22, [#allocation8], %s258_s23, 0  }
   0xe   :  { %60 = sst [smem:[#allocation10]] %s260_s5  ;;  %s263_s0 = smov [#allocation2 + $0x3]  }
   0xf   :  { %62 = sst [smem:[#allocation10 + $0x1]] %s254_s16  ;;  %s264_s19 = smov 5120  }
  0x10   :  { %64 = sst [smem:[#allocation10 + $0x2]] %s261_s9  ;;  %s67_s24 = scalar_lea.hbm %s373_s4, 7168 }
  0x11   :  { %66 = dma.general %s370_s1, 8192, %s52_s12, %s263_s0, %s257_s22, [#allocation10], %s258_s23, 0  }
  0x12   :  { %75 = sst [smem:[#allocation12]] %s264_s19  ;;  %s265_s25 = smov 320  }
  0x13   :  { %77 = sst [smem:[#allocation12 + $0x1]] %s254_s16  ;;  %s82_s28 = scalar_lea.hbm %s373_s4, 21504 }
  0x14   :  { %79 = sst [smem:[#allocation12 + $0x2]] %s265_s25  ;;  %s266_s29 = smov [#allocation2 + $0x4]  }
  0x15   :  { %81 = dma.general %s371_s2, 10240, %s67_s24, %s266_s29, %s257_s22, [#allocation12], %s258_s23, 0  }
  0x16   :  { %90 = sst [smem:[#allocation14]] %s264_s19  ;;  %s267_s1 = smov [#allocation2 + $0x5]  }
  0x17   :  { %92 = sst [smem:[#allocation14 + $0x1]] %s254_s16  ;;  %s268_s8 = smov 2048  }
  0x18   :  { %94 = sst [smem:[#allocation14 + $0x2]] %s265_s25  ;;  %s97_s11 = scalar_lea.hbm %s373_s4, 12288 }
  0x19   :  { %96 = dma.general %s371_s2, 10240, %s82_s28, %s267_s1, %s257_s22, [#allocation14], %s258_s23, 0  }
  0x1a   :  { %105 = sst [smem:[#allocation16]] %s268_s8  ;;  %s269_s12 = smov 128  }
  0x1b   :  { %107 = sst [smem:[#allocation16 + $0x1]] %s254_s16  ;;  %s112_s15 = scalar_lea.hbm %s373_s4, 26624 }
  0x1c   :  { %109 = sst [smem:[#allocation16 + $0x2]] %s269_s12  ;;  %s270_s0 = smov [#allocation2 + $0x6]  }
  0x1d   :  { %111 = dma.general %s372_s3, 4096, %s97_s11, %s270_s0, %s257_s22, [#allocation16], %s258_s23, 0  }
  0x1e   :  { %120 = sst [smem:[#allocation18]] %s268_s8  ;;  %s271_s2 = smov [#allocation2 + $0x7]  }
  0x1f   :  { %122 = sst [smem:[#allocation18 + $0x1]] %s254_s16 }
  0x20   :  { %124 = sst [smem:[#allocation18 + $0x2]] %s269_s12 }
  0x21   :  { %126 = dma.general %s372_s3, 4096, %s112_s15, %s271_s2, %s257_s22, [#allocation18], %s258_s23, 0  }
  0x22   :  { %237 = dma.done.wait [#allocation2], 6144 }
  0x23   :  { %238 = vsyncadd [#allocation2], 4294961152 }
  0x24   :  { %239 = dma.done.wait [#allocation2 + $0x1], 6144 }
  0x25   :  { %240 = vsyncadd [#allocation2 + $0x1], 4294961152 }
  0x26   :  { %241 = dma.done.wait [#allocation2 + $0x2], 8192 }
  0x27   :  { %242 = vsyncadd [#allocation2 + $0x2], 4294959104 }
  0x28   :  { %243 = dma.done.wait [#allocation2 + $0x3], 8192 }
  0x29   :  { %244 = vsyncadd [#allocation2 + $0x3], 4294959104 }
  0x2a   :  { %245 = dma.done.wait [#allocation2 + $0x4], 10240 }
  0x2b   :  { %246 = vsyncadd [#allocation2 + $0x4], 4294957056 }
  0x2c   :  { %247 = dma.done.wait [#allocation2 + $0x5], 10240 }
  0x2d   :  { %248 = vsyncadd [#allocation2 + $0x5], 4294957056 }
  0x2e   :  { %249 = dma.done.wait [#allocation2 + $0x6], 4096 }
  0x2f   :  { %250 = vsyncadd [#allocation2 + $0x6], 4294963200 }
  0x30   :  { %251 = dma.done.wait [#allocation2 + $0x7], 4096 }
  0x31   :  { %252 = vsyncadd [#allocation2 + $0x7], 4294963200 }
  0x32   :  { %155 = vsyncmov [#allocation2] }
  0x35   :  { %s156_s4 = vpop.sfrf %155 }
  0x36   :  { %p210_p0 = scmp.ne.s32.totalorder %s156_s4, 0 }
  0x38   :  { %160 = shalt.err (%p210_p0)  }
  0x39   :  { %162 = vsyncmov [#allocation2 + $0x1] }
  0x3c   :  { %s163_s3 = vpop.sfrf %162 }
  0x3d   :  { %p211_p1 = scmp.ne.s32.totalorder %s163_s3, 0 }
  0x3f   :  { %167 = shalt.err (%p211_p1)  }
  0x40   :  { %169 = vsyncmov [#allocation2 + $0x2] }
  0x43   :  { %s170_s16 = vpop.sfrf %169 }
  0x44   :  { %p212_p2 = scmp.ne.s32.totalorder %s170_s16, 0 }
  0x46   :  { %174 = shalt.err (%p212_p2)  }
  0x47   :  { %176 = vsyncmov [#allocation2 + $0x3] }
  0x4a   :  { %s177_s22 = vpop.sfrf %176 }
  0x4b   :  { %p213_p3 = scmp.ne.s32.totalorder %s177_s22, 0 }
  0x4d   :  { %181 = shalt.err (%p213_p3)  }
  0x4e   :  { %183 = vsyncmov [#allocation2 + $0x4] }
  0x51   :  { %s184_s23 = vpop.sfrf %183 }
  0x52   :  { %p214_p4 = scmp.ne.s32.totalorder %s184_s23, 0 }
  0x54   :  { %188 = shalt.err (%p214_p4)  }
  0x55   :  { %190 = vsyncmov [#allocation2 + $0x5] }
  0x58   :  { %s191_s21 = vpop.sfrf %190 }
  0x59   :  { %p215_p5 = scmp.ne.s32.totalorder %s191_s21, 0 }
  0x5b   :  { %195 = shalt.err (%p215_p5)  }
  0x5c   :  { %197 = vsyncmov [#allocation2 + $0x6] }
  0x5f   :  { %s198_s24 = vpop.sfrf %197 }
  0x60   :  { %p216_p6 = scmp.ne.s32.totalorder %s198_s24, 0 }
  0x62   :  { %202 = shalt.err (%p216_p6)  }
  0x63   :  { %204 = vsyncmov [#allocation2 + $0x7] }
  0x66   :  { %s205_s25 = vpop.sfrf %204 }
  0x67   :  { %p217_p7 = scmp.ne.s32.totalorder %s205_s25, 0 }
  0x69   :  { %209 = shalt.err (%p217_p7)  }

</bundles_post_ra>
